<compile_context>
chip_gen: v6e
topology: v6e:2x2x1
jax: 0.10.0
libtpu: 0.0.40
codegen_flags: <defaults>
</compile_context>

<pallas_src>
import functools

import jax
import jax.numpy as jnp
from jax import lax
from jax.experimental import pallas as pl
from jax.experimental.pallas import tpu as pltpu


def critic_kernel(x_ref, w1_ref, b1_ref, w2_ref, b2_ref, o_ref):
    # x_ref : (3,  TB)  input tile, batch on lanes
    # w1_ref: (128, 3)  fc1 weight (out_features, in_features), VMEM-resident
    # b1_ref: (128, 1)  fc1 bias (column), VMEM-resident
    # w2_ref: (1, 128)  fc2 weight (PyTorch layout), VMEM-resident
    # b2_ref: (1,)      fc2 bias, SMEM scalar
    # o_ref : (1,  TB)  output tile, batch on lanes
    tb = x_ref.shape[1]
    chunk = 256 if tb % 256 == 0 else 128          # (128, chunk) f32 <= 32 vregs

    w1 = w1_ref[...]                                # (128, 3)
    w2 = w2_ref[...]                                # (1, 128)
    b1 = jnp.broadcast_to(b1_ref[...], (128, chunk))  # hoisted: one broadcast total
    b2 = b2_ref[0]                                  # scalar

    # Static chunk loop: chunks are independent, slices are zero-cost views,
    # and the hidden intermediate never exceeds ~32 vregs (no spills).
    for c in range(tb // chunk):
        sl = pl.ds(c * chunk, chunk)
        xc = x_ref[:, sl]                                                  # (3, chunk)
        # fc1 on the MXU (K=3 padded only inside vregs; HBM traffic unchanged)
        h = jnp.dot(w1, xc, preferred_element_type=jnp.float32,
                    precision=lax.Precision.HIGHEST) + b1                 # (128, chunk)
        h = jnp.maximum(h, 0.0)                                            # ReLU (VPU)
        # fc2 on the MXU as well: (1,128) @ (128,chunk) -> (1,chunk)
        out = jnp.dot(w2, h, preferred_element_type=jnp.float32,
                      precision=lax.Precision.HIGHEST) + b2
        o_ref[:, sl] = out.astype(o_ref.dtype)


def _round_up(a, m):
    return (a + m - 1) // m * m


def _choose_tile(B, tile_b):
    """Lane-tile size: large (amortize grid overhead) but never collapse a
    mid-size batch into a single tile (v7x megacore wants >=2 tiles)."""
    b128 = _round_up(B, 128)
    half = max(128, (b128 // 2) // 128 * 128)
    tb = min(tile_b, half)
    b_pad = _round_up(B, tb)
    return tb, b_pad


@functools.partial(jax.jit, static_argnames=("tile_b",))
def critic_forward_lanes(x_lanes, w1, b1, w2, b2, *, tile_b=8192):
    """Kernel-native entry point: x_lanes is (3, B) f32 (batch on lanes).
    Returns (B, 1) f32."""
    B = x_lanes.shape[1]
    tb, b_pad = _choose_tile(B, tile_b)
    if b_pad != B:
        x_lanes = jnp.pad(x_lanes, ((0, 0), (0, b_pad - B)))
    n_tiles = b_pad // tb

    flops = 2 * b_pad * (3 * 128 + 128 * 1)
    bytes_accessed = 4 * (3 * b_pad + b_pad + w1.size + b1.size + w2.size + b2.size)

    out = pl.pallas_call(
        critic_kernel,
        out_shape=jax.ShapeDtypeStruct((1, b_pad), jnp.float32),
        grid=(n_tiles,),
        in_specs=[
            pl.BlockSpec((3, tb), lambda i: (0, i)),            # x tile (lane-dense)
            pl.BlockSpec((128, 3), lambda i: (0, 0)),           # w1: VMEM-resident
            pl.BlockSpec((128, 1), lambda i: (0, 0)),           # b1: VMEM-resident
            pl.BlockSpec((1, 128), lambda i: (0, 0)),           # w2: VMEM-resident
            pl.BlockSpec(memory_space=pltpu.MemorySpace.SMEM),  # b2: 1-D SMEM scalar
        ],
        out_specs=pl.BlockSpec((1, tb), lambda i: (0, i)),      # lane-dense store
        compiler_params=pltpu.CompilerParams(
            dimension_semantics=("parallel",)),                 # megacore on v7x
        cost_estimate=pl.CostEstimate(
            flops=flops, transcendentals=0, bytes_accessed=bytes_accessed),
    )(x_lanes, w1, b1, w2, b2)

    return out[0, :B].reshape(B, 1)


def critic_forward(x, w1, b1, w2, b2, *, tile_b=8192):
    """PyTorch-layout convenience: x is (B, 3). For hot paths keep activations
    in (3, B) layout upstream and call critic_forward_lanes directly (avoids
    this extra transpose pass)."""
    return critic_forward_lanes(x.T, w1, b1, w2, b2, tile_b=tile_b)


def init_params(key):
    """torch.nn.Linear default init (U[-1/sqrt(fan_in), +1/sqrt(fan_in)])."""
    k1, k2, k3, k4 = jax.random.split(key, 4)
    bound1 = 1.0 / jnp.sqrt(3.0)
    bound2 = 1.0 / jnp.sqrt(128.0)
    w1 = jax.random.uniform(k1, (128, 3), jnp.float32, -bound1, bound1)   # fc1.weight
    b1 = jax.random.uniform(k2, (128, 1), jnp.float32, -bound1, bound1)   # fc1.bias (column)
    w2 = jax.random.uniform(k3, (1, 128), jnp.float32, -bound2, bound2)   # fc2.weight
    b2 = jax.random.uniform(k4, (1,), jnp.float32, -bound2, bound2)       # fc2.bias (scalar)
    return w1, b1, w2, b2


if __name__ == "__main__":
    key = jax.random.PRNGKey(0)
    k_x, k_p = jax.random.split(key)

    B = 8  # small batch for the demo
    x = jax.random.normal(k_x, (B, 3), jnp.float32)
    w1, b1, w2, b2 = init_params(k_p)

    out = critic_forward(x, w1, b1, w2, b2)
    out = jax.block_until_ready(out)

    # Pure-JAX reference (same math as the PyTorch module), full f32 precision.
    h_ref = jnp.maximum(
        jnp.dot(x, w1.T, precision=lax.Precision.HIGHEST) + b1[:, 0][None, :], 0.0)
    ref = jnp.dot(h_ref, w2.T, precision=lax.Precision.HIGHEST) + b2[0]

    assert out.shape == (B, 1)
    assert jnp.allclose(out, ref, atol=1e-4, rtol=1e-4)

    print("KERNEL_OK")
</pallas_src>

<mosaic_0001>
module attributes {stable_mosaic.version = 11 : i64} {
  func.func @critic_kernel(%arg0: i32, %arg1: memref<3x128xf32, #tpu.memory_space<vmem>>, %arg2: memref<128x3xf32, #tpu.memory_space<vmem>>, %arg3: memref<128x1xf32, #tpu.memory_space<vmem>>, %arg4: memref<1x128xf32, #tpu.memory_space<vmem>>, %arg5: memref<1xf32, #tpu.memory_space<smem>>, %arg6: memref<1x128xf32, #tpu.memory_space<vmem>>) attributes {dimension_semantics = [#tpu.dimension_semantics<parallel>], iteration_bounds = array<i64: 1>, scalar_prefetch = 0 : i64, scratch_operands = 0 : i64, tpu.core_type = #tpu.core_type<tc>, window_params = [{transform_indices = @transform_0, window_bounds = array<i64: 3, 128>}, {pipeline_mode = #tpu.pipeline_mode<synchronous>, transform_indices = @transform_1, window_bounds = array<i64: 128, 3>}, {pipeline_mode = #tpu.pipeline_mode<synchronous>, transform_indices = @transform_2, window_bounds = array<i64: 128, 1>}, {pipeline_mode = #tpu.pipeline_mode<synchronous>, transform_indices = @transform_3, window_bounds = array<i64: 1, 128>}, {transform_indices = @transform_4, window_bounds = array<i64: 1>}, {transform_indices = @transform_5, window_bounds = array<i64: 1, 128>}]} {
    %c0 = arith.constant 0 : index
    %c0_0 = arith.constant 0 : index
    %0 = vector.load %arg2[%c0, %c0_0] : memref<128x3xf32, #tpu.memory_space<vmem>>, vector<128x3xf32>
    %c0_1 = arith.constant 0 : index
    %c0_2 = arith.constant 0 : index
    %1 = vector.load %arg4[%c0_1, %c0_2] : memref<1x128xf32, #tpu.memory_space<vmem>>, vector<1x128xf32>
    %c0_3 = arith.constant 0 : index
    %c0_4 = arith.constant 0 : index
    %2 = vector.load %arg3[%c0_3, %c0_4] : memref<128x1xf32, #tpu.memory_space<vmem>>, vector<128x1xf32>
    %3 = vector.shape_cast %2 : vector<128x1xf32> to vector<128x1xf32>
    %4 = vector.broadcast %3 : vector<128x1xf32> to vector<128x128xf32>
    %c0_5 = arith.constant 0 : index
    %5 = memref.load %arg5[%c0_5] : memref<1xf32, #tpu.memory_space<smem>>
    %c0_6 = arith.constant 0 : index
    %c0_7 = arith.constant 0 : index
    %6 = vector.load %arg1[%c0_6, %c0_7] : memref<3x128xf32, #tpu.memory_space<vmem>>, vector<3x128xf32>
    %cst = arith.constant dense<0.000000e+00> : vector<128x128xf32>
    %7 = tpu.matmul %0, %6, %cst {dimension_numbers = #tpu.dot_dimension_numbers<[1], [0], [0], [1], [0, 0, 1, 1], [], []>, precision = #tpu.contract_precision<fp32>} : vector<128x3xf32>, vector<3x128xf32>, vector<128x128xf32> -> vector<128x128xf32>
    %8 = arith.addf %7, %4 : vector<128x128xf32>
    %cst_8 = arith.constant 0.000000e+00 : f32
    %9 = vector.broadcast %cst_8 : f32 to vector<128x128xf32>
    %10 = arith.maximumf %8, %9 : vector<128x128xf32>
    %cst_9 = arith.constant dense<0.000000e+00> : vector<1x128xf32>
    %11 = tpu.matmul %1, %10, %cst_9 {dimension_numbers = #tpu.dot_dimension_numbers<[1], [0], [0], [1], [0, 0, 1, 1], [], []>, precision = #tpu.contract_precision<fp32>} : vector<1x128xf32>, vector<128x128xf32>, vector<1x128xf32> -> vector<1x128xf32>
    %12 = vector.broadcast %5 : f32 to vector<1x128xf32>
    %13 = arith.addf %11, %12 : vector<1x128xf32>
    %c0_10 = arith.constant 0 : index
    %c0_11 = arith.constant 0 : index
    %14 = vector.load %arg6[%c0_10, %c0_11] : memref<1x128xf32, #tpu.memory_space<vmem>>, vector<1x128xf32>
    tpu.vector_store %arg6[%c0_10, %c0_11], %13 {strides = array<i32>} : memref<1x128xf32, #tpu.memory_space<vmem>>, vector<1x128xf32>,
    return
  }
  func.func @transform_0(%arg0: i32) -> (i32, i32) {
    %c0_i32 = arith.constant 0 : i32
    %c0_i32_0 = arith.constant 0 : i32
    return %c0_i32, %arg0 : i32, i32
  }
  func.func @transform_1(%arg0: i32) -> (i32, i32) {
    %c0_i32 = arith.constant 0 : i32
    %c0_i32_0 = arith.constant 0 : i32
    %c0_i32_1 = arith.constant 0 : i32
    return %c0_i32, %c0_i32_0 : i32, i32
  }
  func.func @transform_2(%arg0: i32) -> (i32, i32) {
    %c0_i32 = arith.constant 0 : i32
    %c0_i32_0 = arith.constant 0 : i32
    %c0_i32_1 = arith.constant 0 : i32
    return %c0_i32, %c0_i32_0 : i32, i32
  }
  func.func @transform_3(%arg0: i32) -> (i32, i32) {
    %c0_i32 = arith.constant 0 : i32
    %c0_i32_0 = arith.constant 0 : i32
    %c0_i32_1 = arith.constant 0 : i32
    return %c0_i32, %c0_i32_0 : i32, i32
  }
  func.func @transform_4(%arg0: i32) -> i32 {
    %c0_i32 = arith.constant 0 : i32
    %c0_i32_0 = arith.constant 0 : i32
    return %c0_i32 : i32
  }
  func.func @transform_5(%arg0: i32) -> (i32, i32) {
    %c0_i32 = arith.constant 0 : i32
    %c0_i32_0 = arith.constant 0 : i32
    return %c0_i32, %arg0 : i32, i32
  }
}

</mosaic_0001>

<bundles_post_ra>
// kernel: critic_forward_lanes.1
= control target key start
LH: loop header
LB: loop body
LE: loop exit
PB: predicated region body
PF: predicated region fallthrough
CT: control target
= control target key end

     0   :  { %vm185_vm0 = vcmask 1042432   ;;  %vm136_vm1 = vcmask 23552   ;;  %v2518_v3 = vmov 0   ;;  %vm2520_vm2 = vmmov 0   ;;  %s3433_s0 = inlined_call_operand.vmem [shape: f32[3,128], index: 0, kind: input, shape index: {}]   ;;  %s3434_s1 = inlined_call_operand.vmem [shape: f32[128,3], index: 1, kind: input, shape index: {}]   ;;  %s3435_s2 = inlined_call_operand.vmem [shape: f32[128,1], index: 2, kind: input, shape index: {}]   ;;  %s3436_s3 = inlined_call_operand.vmem [shape: f32[1,128], index: 3, kind: input, shape index: {}]   ;;  %s3437_s4 = inlined_call_operand.<no memory space> [shape: f32[1], index: 4, kind: input, shape index: {}]   ;;  %s3438_s5 = inlined_call_operand.vmem [shape: f32[1,128], index: 5, kind: output, shape index: {}]  }
   0x1   :  { %v135_v0 = vld [vmem:[%s3433_s0] sm:$0x7]  ;;  %v22_v2 = vld [vmem:[%s3434_s1 + $0x8] sm:$0xff]  ;;  %2516 = vset.pattern.permute.xlu0 %v2518_v3  ;;  %2517 = vset.pattern.permute.xlu1 %v2518_v3  ;;  %v23_v7 = vld [vmem:[%s3434_s1 + $0x10] sm:$0xff] }
   0x2   :  { %v21_v1 = vld [vmem:[%s3434_s1] sm:$0xff]  ;;  %v187_v4 = vsel %vm185_vm0, %v135_v0, 0  ;;  %v141_v6 = vsel %vm136_vm1, %v22_v2, 0  ;;  %v24_v8 = vld [vmem:[%s3434_s1 + $0x18] sm:$0xff]  ;;  %v144_v13 = vsel %vm136_vm1, %v23_v7, 0  ;;  %v26_v14 = vld [vmem:[%s3434_s1 + $0x28] sm:$0xff] }
   0x3   :  { %v138_v5 = vsel %vm136_vm1, %v21_v1, 0  ;;  %v25_v9 = vld [vmem:[%s3434_s1 + $0x20] sm:$0xff]  ;;  %v2571_v10 = vand.u32 4294901760, %v187_v4  ;;  %v2575_v12 = vand.u32 4294901760, %v141_v6  ;;  %v27_v15 = vld [vmem:[%s3434_s1 + $0x30] sm:$0xff]  ;;  %v2584_v16 = vand.u32 4294901760, %v144_v13 }
   0x4   :  { %v2573_v11 = vand.u32 4294901760, %v138_v5  ;;  %v147_v17 = vsel %vm136_vm1, %v24_v8, 0  ;;  %v150_v18 = vsel %vm136_vm1, %v25_v9, 0  ;;  %v153_v19 = vsel %vm136_vm1, %v26_v14, 0  ;;  %v53_v32 = vld [vmem:[%s3435_s2 + $0x78] sm:$0xff]  ;;  %v51_v33 = vld [vmem:[%s3435_s2 + $0x68] sm:$0xff] }
   0x5   :  { %2147 = vmatprep.subr.mxu0 %v2571_v10  ;;  %v447_v21 = vsub.f32 %v187_v4, %v2571_v10  ;;  %v2595_v22 = vsub.f32 %v141_v6, %v2575_v12  ;;  %v2598_v23 = vand.u32 4294901760, %v147_v17  ;;  %v2602_v24 = vsub.f32 %v144_v13, %v2584_v16  ;;  %131 = vperm.xlu0 %2516, %v53_v32   ;;  %v52_v42 = vld [vmem:[%s3435_s2 + $0x70] sm:$0xff]  ;;  %v50_v43 = vld [vmem:[%s3435_s2 + $0x60] sm:$0xff]  ;;  %v28_v48 = vld [vmem:[%s3434_s1 + $0x38] sm:$0xff] }
   0x6   :  { %v2591_v20 = vsub.f32 %v138_v5, %v2573_v11  ;;  %2175 = vmatprep.mubr.f32.mxu1 %v2573_v11  ;;  %2148 = vmatpush3.msra.mxu0 %v2571_v10  ;;  %v2604_v25 = vand.u32 4294901760, %v150_v18  ;;  %v2606_v26 = vand.u32 4294901760, %v153_v19  ;;  %v156_v27 = vsel %vm136_vm1, %v27_v15, 0  ;;  %v29_v49 = vld [vmem:[%s3434_s1 + $0x40] sm:$0xff]  ;;  %v30_v50 = vld [vmem:[%s3434_s1 + $0x48] sm:$0xff]  ;;  %v31_v59 = vld [vmem:[%s3434_s1 + $0x50] sm:$0xff] }
   0x7   :  { %v2610_v29 = vand.u32 4294901760, %v447_v21  ;;  %2199 = vmatprep.subr.mxu0 %v447_v21  ;;  %v267_v30 = vand.u32 4294901760, %v2595_v22  ;;  %v2614_v31 = vsub.f32 %v147_v17, %v2598_v23  ;;  %v277_v34 = vand.u32 4294901760, %v2602_v24  ;;  %121 = vperm.xlu1 %2517, %v51_v33   ;;  %v32_v60 = vld [vmem:[%s3434_s1 + $0x58] sm:$0xff]  ;;  %v33_v5 = vld [vmem:[%s3434_s1 + $0x60] sm:$0xff]  ;;  %v34_v6 = vld [vmem:[%s3434_s1 + $0x68] sm:$0xff] }
   0x8   :  { %v257_v28 = vand.u32 4294901760, %v2591_v20  ;;  %v2624_v35 = vsub.f32 %v150_v18, %v2604_v25  ;;  %v2627_v36 = vsub.f32 %v153_v19, %v2606_v26  ;;  %v2629_v37 = vand.u32 4294901760, %v156_v27  ;;  %v35_v19 = vld [vmem:[%s3434_s1 + $0x70] sm:$0xff] }
   0x9   :  { %v449_v39 = vsub.f32 %v447_v21, %v2610_v29  ;;  %v268_v40 = vsub.f32 %v2595_v22, %v267_v30  ;;  %v287_v41 = vand.u32 4294901760, %v2614_v31  ;;  %v278_v44 = vsub.f32 %v2602_v24, %v277_v34  ;;  %126 = vperm.xlu0 %2516, %v52_v42  }
   0xa   :  { %v258_v38 = vsub.f32 %v2591_v20, %v257_v28  ;;  %v297_v45 = vand.u32 4294901760, %v2624_v35  ;;  %v307_v46 = vand.u32 4294901760, %v2627_v36  ;;  %v2651_v47 = vsub.f32 %v156_v27, %v2629_v37 }
   0xb   :  { %v450_v52 = vand.u32 4294901760, %v449_v39  ;;  %v269_v53 = vand.u32 4294901760, %v268_v40  ;;  %v288_v54 = vsub.f32 %v2614_v31, %v287_v41  ;;  %v279_v55 = vand.u32 4294901760, %v278_v44  ;;  %116 = vperm.xlu1 %2517, %v50_v43   ;;  %v49_v43 = vld [vmem:[%s3435_s2 + $0x58] sm:$0xff]  ;;  %v48_v44 = vld [vmem:[%s3435_s2 + $0x50] sm:$0xff] }
   0xc   :  { %v259_v51 = vand.u32 4294901760, %v258_v38  ;;  %v298_v56 = vsub.f32 %v2624_v35, %v297_v45  ;;  %v2671_v57 = vsub.f32 %v2627_v36, %v307_v46  ;;  %v317_v58 = vand.u32 4294901760, %v2651_v47 }
   0xd   :  { %2173 = vmatprep.subr.mxu1 %v450_v52  ;;  %v289_v61 = vand.u32 4294901760, %v288_v54  ;;  %v159_v62 = vsel %vm136_vm1, %v28_v48, 0  ;;  %v162_v63 = vsel %vm136_vm1, %v29_v49, 0  ;;  %v165_v0 = vsel %vm136_vm1, %v30_v50, 0  ;;  %111 = vperm.xlu0 %2516, %v49_v43  }
   0xe   :  { %2149 = vmatprep.mubr.f32.mxu0 %v259_v51  ;;  %2174 = vmatpush3.msra.mxu1 %v450_v52  ;;  %v299_v1 = vand.u32 4294901760, %v298_v56  ;;  %v309_v2 = vand.u32 4294901760, %v2671_v57  ;;  %v318_v3 = vsub.f32 %v2651_v47, %v317_v58  ;;  %v2687_v4 = vand.u32 4294901760, %v159_v62  ;;  %v36_v57 = vld [vmem:[%s3434_s1 + $0x78] sm:$0xff] }
   0xf   :  { %2150 = vmatmul.mubr.f32.vlgmr.msra.gmra.mxu0 %v269_v53  ;;  %2176 = vmatmul.mubr.f32.vlgmr.msra.gmra.mxu1 %v2575_v12  ;;  %v2696_v7 = vand.u32 4294901760, %v162_v63  ;;  %v2698_v8 = vand.u32 4294901760, %v165_v0  ;;  %v168_v9 = vsel %vm136_vm1, %v31_v59, 0  ;;  %v171_v13 = vsel %vm136_vm1, %v32_v60, 0 }
  0x10   :  { %2200 = vmatpush3.msra.mxu0 %v447_v21  ;;  %2225 = vmatprep.subr.mxu1 %v2571_v10  ;;  %v319_v14 = vand.u32 4294901760, %v318_v3  ;;  %v2704_v15 = vsub.f32 %v159_v62, %v2687_v4  ;;  %v2706_v17 = vand.u32 4294901760, %v168_v9  ;;  %v2708_v18 = vand.u32 4294901760, %v171_v13 }
  0x11   :  { %2152 = vmatprep.mubr.f32.mxu0 %v279_v55  ;;  %2226 = vmatpush3.msra.mxu1 %v2571_v10  ;;  %v2716_v21 = vsub.f32 %v162_v63, %v2696_v7  ;;  %v2719_v27 = vsub.f32 %v165_v0, %v2698_v8  ;;  %v174_v32 = vsel %vm136_vm1, %v33_v5, 0  ;;  %v177_v33 = vsel %vm136_vm1, %v34_v6, 0  ;;  %v47_v63 = vld [vmem:[%s3435_s2 + $0x48] sm:$0xff]  ;;  %v46_v0 = vld [vmem:[%s3435_s2 + $0x40] sm:$0xff] }
  0x12   :  { %2178 = vmatprep.mubr.f32.mxu1 %v2584_v16  ;;  %v327_v38 = vand.u32 4294901760, %v2704_v15  ;;  %v2725_v39 = vsub.f32 %v168_v9, %v2706_v17  ;;  %v2728_v40 = vsub.f32 %v171_v13, %v2708_v18  ;;  %v2730_v42 = vand.u32 4294901760, %v174_v32  ;;  %2251 = vmatprep.subr.mxu0 %v2610_v29 }
  0x13   :  { %2153 = vmatmul.mubr.f32.gmra.mxu0 %v289_v61  ;;  %2179 = vmatmul.mubr.f32.gmra.mxu1 %v2598_v23  ;;  %v337_v48 = vand.u32 4294901760, %v2716_v21  ;;  %v347_v49 = vand.u32 4294901760, %v2719_v27  ;;  %v2742_v50 = vand.u32 4294901760, %v177_v33  ;;  %v180_v51 = vsel %vm136_vm1, %v35_v19, 0 }
  0x14   :  { %2155 = vmatprep.mubr.f32.mxu0 %v299_v1  ;;  %2181 = vmatprep.mubr.f32.mxu1 %v2604_v25  ;;  %v328_v52 = vsub.f32 %v2704_v15, %v327_v38  ;;  %v357_v53 = vand.u32 4294901760, %v2725_v39  ;;  %v2751_v54 = vsub.f32 %v174_v32, %v2730_v42  ;;  %v2757_v56 = vand.u32 4294901760, %v180_v51  ;;  %v45_v32 = vld [vmem:[%s3435_s2 + $0x38] sm:$0xff] }
  0x15   :  { %2277 = vmatprep.subr.mxu1 %v2571_v10  ;;  %v338_v55 = vsub.f32 %v2716_v21, %v337_v48  ;;  %106 = vperm.xlu1 %2517, %v48_v44   ;;  %v348_v60 = vsub.f32 %v2719_v27, %v347_v49  ;;  %v367_v61 = vand.u32 4294901760, %v2728_v40  ;;  %v2767_v62 = vsub.f32 %v177_v33, %v2742_v50  ;;  %v44_v33 = vld [vmem:[%s3435_s2 + $0x30] sm:$0xff] }
  0x16   :  { %v329_v59 = vand.u32 4294901760, %v328_v52  ;;  %v377_v3 = vand.u32 4294901760, %v2751_v54  ;;  %v2781_v5 = vsub.f32 %v180_v51, %v2757_v56  ;;  %v183_v6 = vsel %vm136_vm1, %v36_v57, 0  ;;  %101 = vperm.xlu0 %2516, %v47_v63   ;;  %v42_v63 = vld [vmem:[%s3435_s2 + $0x20] sm:$0xff] }
  0x17   :  { %2156 = vmatmul.mubr.f32.gmra.mxu0 %v309_v2  ;;  %2182 = vmatmul.mubr.f32.gmra.mxu1 %v2606_v26  ;;  %v339_v1 = vand.u32 4294901760, %v338_v55  ;;  %v358_v2 = vsub.f32 %v2725_v39, %v357_v53  ;;  %v2785_v9 = vand.u32 4294901760, %v183_v6  ;;  %v349_v13 = vand.u32 4294901760, %v348_v60  ;;  %v43_v60 = vld [vmem:[%s3435_s2 + $0x28] sm:$0xff] }
  0x18   :  { %2158 = vmatprep.mubr.f32.mxu0 %v319_v14  ;;  %2184 = vmatprep.mubr.f32.mxu1 %v2629_v37  ;;  %v368_v14 = vsub.f32 %v2728_v40, %v367_v61  ;;  %v387_v19 = vand.u32 4294901760, %v2767_v62  ;;  %v378_v44 = vsub.f32 %v2751_v54, %v377_v3  ;;  %v397_v51 = vand.u32 4294901760, %v2781_v5 }
  0x19   :  { %96 = vperm.xlu1 %2517, %v46_v0   ;;  %v359_v43 = vand.u32 4294901760, %v358_v2  ;;  %v2803_v52 = vsub.f32 %v183_v6, %v2785_v9 }
  0x1a   :  { %91 = vperm.xlu0 %2516, %v45_v32   ;;  %v369_v55 = vand.u32 4294901760, %v368_v14  ;;  %v388_v57 = vsub.f32 %v2767_v62, %v387_v19  ;;  %v379_v0 = vand.u32 4294901760, %v378_v44  ;;  %v40_v14 = vld [vmem:[%s3435_s2 + $0x10] sm:$0xff]  ;;  %v38_v44 = vld [vmem:[%s3435_s2] sm:$0xff] }
  0x1b   :  { %2159 = vmatmul.mubr.f32.gmra.mxu0 %v329_v59  ;;  %2185 = vmatmul.mubr.f32.gmra.mxu1 %v2687_v4  ;;  %v407_v59 = vand.u32 4294901760, %v2803_v52 }
  0x1c   :  { %2161 = vmatprep.mubr.f32.mxu0 %v339_v1  ;;  %2187 = vmatprep.mubr.f32.mxu1 %v2696_v7  ;;  %v398_v1 = vsub.f32 %v2781_v5, %v397_v51  ;;  %v389_v2 = vand.u32 4294901760, %v388_v57 }
  0x1d   :  { %86 = vperm.xlu1 %2517, %v44_v33   ;;  %v408_v6 = vsub.f32 %v2803_v52, %v407_v59 }
  0x1e   :  { %81 = vperm.xlu0 %2516, %v43_v60   ;;  %v399_v32 = vand.u32 4294901760, %v398_v1 }
  0x1f   :  { %2162 = vmatmul.mubr.f32.gmra.mxu0 %v349_v13  ;;  %2188 = vmatmul.mubr.f32.gmra.mxu1 %v2698_v8  ;;  %v41_v13 = vld [vmem:[%s3435_s2 + $0x18] sm:$0xff]  ;;  %v409_v33 = vand.u32 4294901760, %v408_v6 }
  0x20   :  { %2164 = vmatprep.mubr.f32.mxu0 %v359_v43  ;;  %2190 = vmatprep.mubr.f32.mxu1 %v2706_v17  ;;  %v39_v43 = vld [vmem:[%s3435_s2 + $0x8] sm:$0xff] }
  0x21   :  { %76 = vperm.xlu1 %2517, %v42_v63  }
  0x22   :  { %71 = vperm.xlu0 %2516, %v41_v13  }
  0x23   :  { %2165 = vmatmul.mubr.f32.gmra.mxu0 %v369_v55  ;;  %2191 = vmatmul.mubr.f32.gmra.mxu1 %v2708_v18 }
  0x24   :  { %2167 = vmatprep.mubr.f32.mxu0 %v379_v0  ;;  %2193 = vmatprep.mubr.f32.mxu1 %v2730_v42 }
  0x25   :  { %66 = vperm.xlu1 %2517, %v40_v14  }
  0x26   :  { %61 = vperm.xlu0 %2516, %v39_v43  }
  0x27   :  { %2168 = vmatmul.mubr.f32.gmra.mxu0 %v389_v2  ;;  %2194 = vmatmul.mubr.f32.gmra.mxu1 %v2742_v50 }
  0x28   :  { %2170 = vmatprep.mubr.f32.mxu0 %v399_v32  ;;  %2196 = vmatprep.mubr.f32.mxu1 %v2757_v56 }
  0x29   :  { %56 = vperm.xlu1 %2517, %v38_v44  }
  0x2b   :  { %2171 = vmatmul.mubr.f32.gmra.mxu0 %v409_v33  ;;  %2197 = vmatmul.mubr.f32.gmra.mxu1 %v2785_v9 }
  0x2c   :  { %2201 = vmatprep.mubr.f32.mxu0 %v2591_v20  ;;  %2227 = vmatprep.mubr.f32.mxu1 %v257_v28 }
  0x2f   :  { %2202 = vmatmul.mubr.f32.vlgmr.msra.gmra.mxu0 %v2595_v22  ;;  %2228 = vmatmul.mubr.f32.vlgmr.msra.gmra.mxu1 %v267_v30 }
  0x30   :  { %2252 = vmatpush3.msra.mxu0 %v2610_v29  ;;  %2278 = vmatpush3.msra.mxu1 %v2571_v10 }
  0x31   :  { %2204 = vmatprep.mubr.f32.mxu0 %v2602_v24  ;;  %2230 = vmatprep.mubr.f32.mxu1 %v277_v34 }
  0x33   :  { %2205 = vmatmul.mubr.f32.gmra.mxu0 %v2614_v31  ;;  %2231 = vmatmul.mubr.f32.gmra.mxu1 %v287_v41 }
  0x34   :  { %2207 = vmatprep.mubr.f32.mxu0 %v2624_v35  ;;  %2233 = vmatprep.mubr.f32.mxu1 %v297_v45 }
  0x37   :  { %2208 = vmatmul.mubr.f32.gmra.mxu0 %v2627_v36  ;;  %2234 = vmatmul.mubr.f32.gmra.mxu1 %v307_v46 }
  0x38   :  { %2210 = vmatprep.mubr.f32.mxu0 %v2651_v47  ;;  %2236 = vmatprep.mubr.f32.mxu1 %v317_v58 }
  0x3b   :  { %2211 = vmatmul.mubr.f32.gmra.mxu0 %v2704_v15  ;;  %2237 = vmatmul.mubr.f32.gmra.mxu1 %v327_v38 }
  0x3c   :  { %2213 = vmatprep.mubr.f32.mxu0 %v2716_v21  ;;  %2239 = vmatprep.mubr.f32.mxu1 %v337_v48 }
  0x3f   :  { %2214 = vmatmul.mubr.f32.gmra.mxu0 %v2719_v27  ;;  %2240 = vmatmul.mubr.f32.gmra.mxu1 %v347_v49 }
  0x40   :  { %2216 = vmatprep.mubr.f32.mxu0 %v2725_v39  ;;  %2242 = vmatprep.mubr.f32.mxu1 %v357_v53 }
  0x43   :  { %2217 = vmatmul.mubr.f32.gmra.mxu0 %v2728_v40  ;;  %2243 = vmatmul.mubr.f32.gmra.mxu1 %v367_v61 }
  0x44   :  { %2219 = vmatprep.mubr.f32.mxu0 %v2751_v54  ;;  %2245 = vmatprep.mubr.f32.mxu1 %v377_v3 }
  0x47   :  { %2220 = vmatmul.mubr.f32.gmra.mxu0 %v2767_v62  ;;  %2246 = vmatmul.mubr.f32.gmra.mxu1 %v387_v19 }
  0x48   :  { %2222 = vmatprep.mubr.f32.mxu0 %v2781_v5  ;;  %2248 = vmatprep.mubr.f32.mxu1 %v397_v51 }
  0x4b   :  { %2223 = vmatmul.mubr.f32.gmra.mxu0 %v2803_v52  ;;  %2249 = vmatmul.mubr.f32.gmra.mxu1 %v407_v59 }
  0x4c   :  { %2253 = vmatprep.mubr.f32.mxu0 %v2573_v11  ;;  %2279 = vmatprep.mubr.f32.mxu1 %v2573_v11 }
  0x4f   :  { %2254 = vmatmul.mubr.f32.vlgmr.msra.gmra.mxu0 %v2575_v12  ;;  %2280 = vmatmul.mubr.f32.vlgmr.msra.gmra.mxu1 %v2575_v12 }
  0x50   :  { %2256 = vmatprep.mubr.f32.mxu0 %v2584_v16  ;;  %2282 = vmatprep.mubr.f32.mxu1 %v2584_v16 }
  0x53   :  { %2257 = vmatmul.mubr.f32.gmra.mxu0 %v2598_v23  ;;  %2283 = vmatmul.mubr.f32.gmra.mxu1 %v2598_v23  ;;  %v3439_v23 = vmov 0.0  }
  0x54   :  { %2259 = vmatprep.mubr.f32.mxu0 %v2604_v25  ;;  %2285 = vmatprep.mubr.f32.mxu1 %v2604_v25 }
  0x55   :  { %2303 = vmatprep.subr.mxu0 %v3439_v23  ;;  %2338 = vmatprep.subr.mxu1 %v3439_v23 }
  0x57   :  { %2260 = vmatmul.mubr.f32.gmra.mxu0 %v2606_v26  ;;  %2286 = vmatmul.mubr.f32.gmra.mxu1 %v2606_v26 }
  0x58   :  { %2262 = vmatprep.mubr.f32.mxu0 %v2629_v37  ;;  %2288 = vmatprep.mubr.f32.mxu1 %v2629_v37 }
  0x5b   :  { %2263 = vmatmul.mubr.f32.gmra.mxu0 %v2687_v4  ;;  %2289 = vmatmul.mubr.f32.gmra.mxu1 %v2687_v4 }
  0x5c   :  { %2265 = vmatprep.mubr.f32.mxu0 %v2696_v7  ;;  %2291 = vmatprep.mubr.f32.mxu1 %v2696_v7 }
  0x5f   :  { %2266 = vmatmul.mubr.f32.gmra.mxu0 %v2698_v8  ;;  %2292 = vmatmul.mubr.f32.gmra.mxu1 %v2698_v8 }
  0x60   :  { %2268 = vmatprep.mubr.f32.mxu0 %v2706_v17  ;;  %2294 = vmatprep.mubr.f32.mxu1 %v2706_v17 }
  0x63   :  { %2269 = vmatmul.mubr.f32.gmra.mxu0 %v2708_v18  ;;  %2295 = vmatmul.mubr.f32.gmra.mxu1 %v2708_v18 }
  0x64   :  { %2271 = vmatprep.mubr.f32.mxu0 %v2730_v42  ;;  %2297 = vmatprep.mubr.f32.mxu1 %v2730_v42 }
  0x67   :  { %2272 = vmatmul.mubr.f32.gmra.mxu0 %v2742_v50  ;;  %2298 = vmatmul.mubr.f32.gmra.mxu1 %v2742_v50 }
  0x68   :  { %2274 = vmatprep.mubr.f32.mxu0 %v2757_v56  ;;  %2300 = vmatprep.mubr.f32.mxu1 %v2757_v56 }
  0x6b   :  { %2275 = vmatmul.mubr.f32.gmra.mxu0 %v2785_v9  ;;  %2301 = vmatmul.mubr.f32.gmra.mxu1 %v2785_v9 }
  0x6c   :  { %2335 = vmatprep.mubr.msk.f32.mxu0 %vm2520_vm2, %v3439_v23  ;;  %2370 = vmatprep.mubr.msk.f32.mxu1 %vm2520_vm2, %v3439_v23 }
  0x80   :  { %v2923_v10 = vpop.permute.xlu0 %131 }
  0x82   :  { %v2925_v11 = vpop.permute.xlu1 %121 }
  0x84   :  { %v2927_v12 = vpop.permute.xlu0 %126 }
  0x86   :  { %v2929_v16 = vpop.permute.xlu1 %116 }
  0x88   :  { %v112_v20 = vpop.permute.xlu0 %111 }
  0x90   :  { %v107_v22 = vpop.permute.xlu1 %106 }
  0x91   :  { %v102_v24 = vpop.permute.xlu0 %101 }
  0x94   :  { %v97_v25 = vpop.permute.xlu1 %96 }
  0x95   :  { %v92_v26 = vpop.permute.xlu0 %91 }
  0x98   :  { %v87_v28 = vpop.permute.xlu1 %86 }
  0x99   :  { %v82_v29 = vpop.permute.xlu0 %81 }
  0x9c   :  { %v77_v30 = vpop.permute.xlu1 %76 }
  0x9d   :  { %v72_v31 = vpop.permute.xlu0 %71 }
  0xa0   :  { %v67_v34 = vpop.permute.xlu1 %66 }
  0xa1   :  { %v62_v35 = vpop.permute.xlu0 %61 }
  0xa4   :  { %v57_v37 = vpop.permute.xlu1 %56 }
  0xcf   :  { %v2151_v36 = vpop.f32.mrf.mxu0  ;;  %v2177_v45 = vpop.f32.mrf.mxu1 }
  0xd0   :  { %v272_v41 = vadd.f32 %v2151_v36, %v62_v35 }
  0xd1   :  { %v261_v46 = vpop.f32.mrf.mxu0  ;;  %v487_v4 = vpop.f32.mrf.mxu1 }
  0xd2   :  { %v494_v47 = vadd.f32 %v2177_v45, %v272_v41  ;;  %v262_v58 = vadd.f32 %v261_v46, %v57_v37 }
  0xd3   :  { %v2154_v7 = vpop.f32.mrf.mxu0  ;;  %v2180_v17 = vpop.f32.mrf.mxu1 }
  0xd4   :  { %v488_v8 = vadd.f32 %v487_v4, %v262_v58  ;;  %v292_v15 = vadd.f32 %v2154_v7, %v72_v31 }
  0xd5   :  { %v281_v18 = vpop.f32.mrf.mxu0  ;;  %v499_v38 = vpop.f32.mrf.mxu1 }
  0xd6   :  { %v506_v21 = vadd.f32 %v2180_v17, %v292_v15  ;;  %v282_v27 = vadd.f32 %v281_v18, %v67_v34 }
  0xd7   :  { %v2157_v39 = vpop.f32.mrf.mxu0  ;;  %v2183_v48 = vpop.f32.mrf.mxu1 }
  0xd8   :  { %v500_v40 = vadd.f32 %v499_v38, %v282_v27  ;;  %v312_v42 = vadd.f32 %v2157_v39, %v82_v29 }
  0xd9   :  { %v301_v49 = vpop.f32.mrf.mxu0  ;;  %v511_v54 = vpop.f32.mrf.mxu1 }
  0xda   :  { %v518_v50 = vadd.f32 %v2183_v48, %v312_v42  ;;  %v302_v53 = vadd.f32 %v301_v49, %v77_v30 }
  0xdb   :  { %v2160_v56 = vpop.f32.mrf.mxu0  ;;  %v2186_v3 = vpop.f32.mrf.mxu1 }
  0xdc   :  { %v512_v61 = vadd.f32 %v511_v54, %v302_v53  ;;  %v332_v62 = vadd.f32 %v2160_v56, %v92_v26 }
  0xdd   :  { %v321_v5 = vpop.f32.mrf.mxu0  ;;  %v523_v51 = vpop.f32.mrf.mxu1 }
  0xde   :  { %v2937_v9 = vadd.f32 %v2186_v3, %v332_v62  ;;  %v322_v19 = vadd.f32 %v321_v5, %v87_v28 }
  0xdf   :  { %v2163_v52 = vpop.f32.mrf.mxu0  ;;  %v2189_v59 = vpop.f32.mrf.mxu1 }
  0xe0   :  { %v2939_v55 = vadd.f32 %v523_v51, %v322_v19  ;;  %v352_v57 = vadd.f32 %v2163_v52, %v102_v24 }
  0xe1   :  { %v341_v60 = vpop.f32.mrf.mxu0  ;;  %v535_v1 = vpop.f32.mrf.mxu1 }
  0xe2   :  { %v2941_v63 = vadd.f32 %v2189_v59, %v352_v57  ;;  %v342_v0 = vadd.f32 %v341_v60, %v97_v25 }
  0xe3   :  { %v2166_v2 = vpop.f32.mrf.mxu0  ;;  %v2192_v14 = vpop.f32.mrf.mxu1 }
  0xe4   :  { %v2943_v6 = vadd.f32 %v535_v1, %v342_v0  ;;  %v372_v13 = vadd.f32 %v2166_v2, %v112_v20 }
  0xe5   :  { %v361_v32 = vpop.f32.mrf.mxu0  ;;  %v547_v44 = vpop.f32.mrf.mxu1 }
  0xe6   :  { %v2945_v33 = vadd.f32 %v2192_v14, %v372_v13  ;;  %v362_v43 = vadd.f32 %v361_v32, %v107_v22 }
  0xe7   :  { %v2169_v26 = vpop.f32.mrf.mxu0  ;;  %v2195_v29 = vpop.f32.mrf.mxu1 }
  0xe8   :  { %v2947_v28 = vadd.f32 %v547_v44, %v362_v43  ;;  %v392_v24 = vadd.f32 %v2169_v26, %v2925_v11 }
  0xe9   :  { %v381_v30 = vpop.f32.mrf.mxu0  ;;  %v559_v34 = vpop.f32.mrf.mxu1 }
  0xea   :  { %v2950_v31 = vadd.f32 %v2195_v29, %v392_v24  ;;  %v382_v25 = vadd.f32 %v381_v30, %v2929_v16 }
  0xeb   :  { %v2953_v35 = vpop.f32.mrf.mxu0  ;;  %v2957_v36 = vpop.f32.mrf.mxu1 }
  0xec   :  { %v2955_v20 = vadd.f32 %v559_v34, %v382_v25 }
  0xed   :  { %v2959_v22 = vpop.f32.mrf.mxu0  ;;  %v2961_v37 = vpop.f32.mrf.mxu1 }
  0xef   :  { %v2203_v41 = vpop.f32.mrf.mxu0  ;;  %v2229_v11 = vpop.f32.mrf.mxu1 }
  0xf0   :  { %v659_v45 = vadd.f32 %v2203_v41, %v494_v47 }
  0xf1   :  { %v651_v46 = vpop.f32.mrf.mxu0  ;;  %v830_v7 = vpop.f32.mrf.mxu1 }
  0xf2   :  { %v2963_v58 = vadd.f32 %v2229_v11, %v659_v45  ;;  %v652_v4 = vadd.f32 %v651_v46, %v488_v8 }
  0xf3   :  { %v2206_v16 = vpop.f32.mrf.mxu0  ;;  %v2232_v18 = vpop.f32.mrf.mxu1 }
  0xf4   :  { %v2965_v15 = vadd.f32 %v830_v7, %v652_v4  ;;  %v673_v17 = vadd.f32 %v2206_v16, %v506_v21 }
  0xf5   :  { %v665_v27 = vpop.f32.mrf.mxu0  ;;  %v846_v42 = vpop.f32.mrf.mxu1 }
  0xf6   :  { %3441 = vst [vmem:[#allocation3_spill] sm:$0xff] %v2965_v15  ;;  %v2967_v38 = vadd.f32 %v2232_v18, %v673_v17  ;;  %v666_v39 = vadd.f32 %v665_v27, %v500_v40 }
  0xf7   :  { %v2209_v48 = vpop.f32.mrf.mxu0  ;;  %v2235_v53 = vpop.f32.mrf.mxu1 }
  0xf8   :  { %v2969_v49 = vadd.f32 %v846_v42, %v666_v39  ;;  %v687_v47 = vadd.f32 %v2209_v48, %v518_v50  ;;  %v412_v48 = vadd.f32 %v2953_v35, %v2923_v10 }
  0xf9   :  { %v679_v54 = vpop.f32.mrf.mxu0  ;;  %v862_v62 = vpop.f32.mrf.mxu1 }
  0xfa   :  { %v2971_v56 = vadd.f32 %v2235_v53, %v687_v47  ;;  %v680_v8 = vadd.f32 %v679_v54, %v512_v61 }
  0xfb   :  { %v2212_v3 = vpop.f32.mrf.mxu0  ;;  %v2975_v21 = vpop.f32.mrf.mxu1 }
  0xfc   :  { %v2973_v5 = vadd.f32 %v862_v62, %v680_v8  ;;  %v402_v8 = vadd.f32 %v2959_v22, %v2927_v12 }
  0xfd   :  { %v693_v19 = vpop.f32.mrf.mxu0  ;;  %v2977_v51 = vpop.f32.mrf.mxu1 }
  0xff   :  { %v2215_v40 = vpop.f32.mrf.mxu0  ;;  %v2241_v52 = vpop.f32.mrf.mxu1 }
 0x101   :  { %v707_v57 = vpop.f32.mrf.mxu0  ;;  %v894_v59 = vpop.f32.mrf.mxu1 }
 0x102   :  { %v708_v10 = vadd.f32 %v707_v57, %v2943_v6 }
 0x103   :  { %v2218_v60 = vpop.f32.mrf.mxu0  ;;  %v2244_v50 = vpop.f32.mrf.mxu1 }
 0x104   :  { %v729_v47 = vadd.f32 %v2218_v60, %v2945_v33  ;;  %v572_v60 = vadd.f32 %v2961_v37, %v402_v8  ;;  %v895_v6 = vadd.f32 %v894_v59, %v708_v10 }
 0x105   :  { %v721_v0 = vpop.f32.mrf.mxu0  ;;  %v910_v1 = vpop.f32.mrf.mxu1 }
 0x106   :  { %v722_v62 = vadd.f32 %v721_v0, %v2947_v28  ;;  %v919_v15 = vadd.f32 %v2244_v50, %v729_v47 }
 0x107   :  { %v2221_v2 = vpop.f32.mrf.mxu0  ;;  %v2247_v13 = vpop.f32.mrf.mxu1 }
 0x108   :  { %v911_v12 = vadd.f32 %v910_v1, %v722_v62 }
 0x109   :  { %v735_v61 = vpop.f32.mrf.mxu0  ;;  %v926_v14 = vpop.f32.mrf.mxu1 }
 0x10a   :  { %v736_v33 = vadd.f32 %v735_v61, %v2955_v20 }
 0x10b   :  { %v2224_v32 = vpop.f32.mrf.mxu0  ;;  %v2250_v43 = vpop.f32.mrf.mxu1 }
 0x10c   :  { %v927_v57 = vadd.f32 %v926_v14, %v736_v33 }
 0x10d   :  { %v749_v44 = vpop.f32.mrf.mxu0  ;;  %v942_v26 = vpop.f32.mrf.mxu1 }
 0x10e   :  { %v750_v50 = vadd.f32 %v749_v44, %v572_v60 }
 0x10f   :  { %v2979_v24 = vpop.f32.mrf.mxu0  ;;  %v2981_v29 = vpop.f32.mrf.mxu1 }
 0x110   :  { %3442 = vst [vmem:[#allocation4_spill] sm:$0xff] %v2981_v29  ;;  %v743_v29 = vadd.f32 %v2221_v2, %v2950_v31 }
 0x111   :  { %v2983_v30 = vpop.f32.mrf.mxu0  ;;  %v2985_v25 = vpop.f32.mrf.mxu1 }
 0x112   :  { %3443 = vst [vmem:[#allocation5_spill] sm:$0xff] %v2983_v30  ;;  %3444 = vst [vmem:[#allocation6_spill] sm:$0xff] %v2985_v25  ;;  %v715_v25 = vadd.f32 %v2215_v40, %v2941_v63  ;;  %v578_v30 = vadd.f32 %v2957_v36, %v412_v48  ;;  %v701_v63 = vadd.f32 %v2212_v3, %v2937_v9 }
 0x113   :  { %v2987_v34 = vpop.f32.mrf.mxu0  ;;  %v2989_v41 = vpop.f32.mrf.mxu1  ;;  %v935_v31 = vadd.f32 %v2247_v13, %v743_v29  ;;  %v694_v36 = vadd.f32 %v693_v19, %v2939_v55  ;;  %v943_v55 = vadd.f32 %v942_v26, %v750_v50 }
 0x114   :  { %3445 = vst [vmem:[#allocation7_spill] sm:$0xff] %v2989_v41  ;;  %v757_v22 = vadd.f32 %v2224_v32, %v578_v30  ;;  %v903_v40 = vadd.f32 %v2241_v52, %v715_v25 }
 0x115   :  { %v2991_v45 = vpop.f32.mrf.mxu0  ;;  %v2993_v11 = vpop.f32.mrf.mxu1  ;;  %v879_v13 = vadd.f32 %v2977_v51, %v694_v36 }
 0x116   :  { %3446 = vst [vmem:[#allocation8_spill] sm:$0xff] %v2993_v11  ;;  %v951_v37 = vadd.f32 %v2250_v43, %v757_v22 }
 0x117   :  { %v2995_v46 = vpop.f32.mrf.mxu0  ;;  %v2997_v4 = vpop.f32.mrf.mxu1 }
 0x119   :  { %v2999_v7 = vpop.f32.mrf.mxu0  ;;  %v3001_v16 = vpop.f32.mrf.mxu1 }
 0x11a   :  { %3447 = vst [vmem:[#allocation9_spill] sm:$0xff] %v3001_v16 }
 0x11b   :  { %v2264_v17 = vpop.f32.mrf.mxu0  ;;  %v3003_v18 = vpop.f32.mrf.mxu1 }
 0x11d   :  { %v1060_v27 = vpop.f32.mrf.mxu0  ;;  %v3005_v39 = vpop.f32.mrf.mxu1 }
 0x11f   :  { %v2267_v42 = vpop.f32.mrf.mxu0  ;;  %v2293_v53 = vpop.f32.mrf.mxu1 }
 0x120   :  { %v1079_v20 = vadd.f32 %v2267_v42, %v903_v40 }
 0x121   :  { %v1072_v54 = vpop.f32.mrf.mxu0  ;;  %v1234_v23 = vpop.f32.mrf.mxu1 }
 0x122   :  { %v1073_v30 = vadd.f32 %v1072_v54, %v895_v6  ;;  %v1241_v14 = vadd.f32 %v2293_v53, %v1079_v20 }
 0x123   :  { %v2270_v11 = vpop.f32.mrf.mxu0  ;;  %v2296_v41 = vpop.f32.mrf.mxu1 }
 0x124   :  { %v1091_v28 = vadd.f32 %v2270_v11, %v919_v15  ;;  %v887_v15 = vadd.f32 %v2975_v21, %v701_v63  ;;  %v1061_v21 = vadd.f32 %v1060_v27, %v879_v13  ;;  %v1235_v54 = vadd.f32 %v1234_v23, %v1073_v30  ;;  %v3451_v13 = vld [vmem:[#allocation3_spill] sm:$0xff] }
 0x125   :  { %v1084_v35 = vpop.f32.mrf.mxu0  ;;  %v1246_v0 = vpop.f32.mrf.mxu1  ;;  %v1289_v53 = vmax.f32 %v1241_v14, 0.0 }
 0x126   :  { %v1085_v48 = vadd.f32 %v1084_v35, %v911_v12  ;;  %v1253_v1 = vadd.f32 %v2296_v41, %v1091_v28  ;;  %v1067_v59 = vadd.f32 %v2264_v17, %v887_v15  ;;  %v1055_v35 = vadd.f32 %v2995_v46, %v2971_v56 }
 0x127   :  { %v2273_v2 = vpop.f32.mrf.mxu0  ;;  %v2299_v47 = vpop.f32.mrf.mxu1  ;;  %v1031_v28 = vadd.f32 %v2979_v24, %v2963_v58  ;;  %v1049_v56 = vadd.f32 %v2999_v7, %v2973_v5  ;;  %v3044_v46 = vadd.f32 %v3005_v39, %v1061_v21  ;;  %v1043_v58 = vadd.f32 %v2987_v34, %v2967_v38  ;;  %v3449_v34 = vld [vmem:[#allocation9_spill] sm:$0xff] }
 0x128   :  { %v1103_v61 = vadd.f32 %v2273_v2, %v935_v31  ;;  %v1247_v19 = vadd.f32 %v1246_v0, %v1085_v48  ;;  %v1291_v43 = vmax.f32 %v1253_v1, 0.0  ;;  %v3028_v17 = vadd.f32 %v3003_v18, %v1067_v59 }
 0x129   :  { %v1096_v16 = vpop.f32.mrf.mxu0  ;;  %v1258_v32 = vpop.f32.mrf.mxu1  ;;  %v1288_v18 = vmax.f32 %v1235_v54, 0.0  ;;  %v3060_v5 = vadd.f32 %v2997_v4, %v1055_v35  ;;  %v3063_v7 = vand.u32 4294901760, %v1289_v53  ;;  %v3448_v39 = vmov 0.0   ;;  %v3455_v35 = vld [vmem:[#allocation6_spill] sm:$0xff] }
 0x12a   :  { %v1265_v9 = vadd.f32 %v2299_v47, %v1103_v61  ;;  %v1097_v3 = vadd.f32 %v1096_v16, %v927_v57  ;;  %v1290_v33 = vmax.f32 %v1247_v19, 0.0  ;;  %v3032_v12 = vand.u32 4294901760, %v1291_v43 }
 0x12b   :  { %v2276_v52 = vpop.f32.mrf.mxu0  ;;  %v2302_v29 = vpop.f32.mrf.mxu1  ;;  %v1287_v24 = vmax.f32 %v3028_v17, 0.0  ;;  %v1037_v38 = vadd.f32 %v2991_v45, %v2969_v49  ;;  %v3078_v4 = vadd.f32 %v3449_v34, %v1049_v56  ;;  %v1286_v47 = vmax.f32 %v3044_v46, 0.0  ;;  %v3450_v45 = vld [vmem:[#allocation7_spill] sm:$0xff] }
 0x12c   :  { %v1115_v44 = vadd.f32 %v2276_v52, %v951_v37  ;;  %v1293_v25 = vmax.f32 %v1265_v9, 0.0  ;;  %v1259_v11 = vadd.f32 %v1258_v32, %v1097_v3  ;;  %v3046_v0 = vand.u32 4294901760, %v1290_v33 }
 0x12d   :  { %v1108_v42 = vpop.f32.mrf.mxu0  ;;  %v1270_v62 = vpop.f32.mrf.mxu1  ;;  %v3067_v2 = vsub.f32 %v1291_v43, %v3032_v12  ;;  %v3081_v6 = vand.u32 4294901760, %v1288_v18  ;;  %v3094_v37 = vadd.f32 %v3450_v45, %v1043_v58  ;;  %v1285_v1 = vmax.f32 %v3060_v5, 0.0 }
 0x12e   :  { %v1277_v41 = vadd.f32 %v2302_v29, %v1115_v44  ;;  %v1109_v8 = vadd.f32 %v1108_v42, %v943_v55  ;;  %v3023_v10 = vand.u32 4294901760, %v1293_v25  ;;  %v1292_v16 = vmax.f32 %v1259_v11, 0.0  ;;  %v3452_v55 = vld [vmem:[#allocation5_spill] sm:$0xff]  ;;  %v3453_v44 = vld [vmem:[#allocation8_spill] sm:$0xff] }
 0x12f   :  { %v3085_v57 = vsub.f32 %v1290_v33, %v3046_v0  ;;  %v3097_v32 = vand.u32 4294901760, %v1287_v24  ;;  %v3100_v15 = vsub.f32 %v1289_v53, %v3063_v7  ;;  %v1419_v30 = vand.u32 4294901760, %v3067_v2 }
 0x130   :  { %v1295_v51 = vmax.f32 %v1277_v41, 0.0  ;;  %v1271_v26 = vadd.f32 %v1270_v62, %v1109_v8  ;;  %v3030_v60 = vand.u32 4294901760, %v1292_v16  ;;  %v3035_v27 = vsub.f32 %v1293_v25, %v3023_v10  ;;  %v37_v41 = vld [vmem:[%s3436_s3] sm:$0x1]  ;;  %v3454_v8 = vld [vmem:[#allocation4_spill] sm:$0xff] }
 0x131   :  { %v1025_v19 = vadd.f32 %v3452_v55, %v3451_v13  ;;  %v3114_v29 = vadd.f32 %v3453_v44, %v1037_v38  ;;  %v1284_v59 = vmax.f32 %v3078_v4, 0.0  ;;  %v3117_v14 = vand.u32 4294901760, %v1286_v47 }
 0x132   :  { %v3037_v23 = vand.u32 4294901760, %v1295_v51  ;;  %v1294_v22 = vmax.f32 %v1271_v26, 0.0  ;;  %v3049_v63 = vsub.f32 %v1292_v16, %v3030_v60  ;;  %v1405_v36 = vand.u32 4294901760, %v3035_v27 }
 0x133   :  { %v3121_v25 = vsub.f32 %v1288_v18, %v3081_v6  ;;  %v1426_v11 = vand.u32 4294901760, %v3085_v57  ;;  %v3132_v62 = vadd.f32 %v3454_v8, %v1031_v28  ;;  %v1283_v21 = vmax.f32 %v3094_v37, 0.0 }
 0x134   :  { %v3052_v40 = vsub.f32 %v1295_v51, %v3037_v23  ;;  %v3054_v31 = vand.u32 4294901760, %v1294_v22  ;;  %2304 = vmatpush3.msra.mxu0 %v3037_v23  ;;  %v1412_v20 = vand.u32 4294901760, %v3049_v63  ;;  %v1406_v9 = vsub.f32 %v3035_v27, %v1405_v36 }
 0x135   :  { %2305 = vmatprep.subr.mxu0 %v3448_v39  ;;  %v3135_v54 = vand.u32 4294901760, %v1285_v1  ;;  %v3140_v16 = vsub.f32 %v1287_v24, %v3097_v32  ;;  %v1433_v33 = vand.u32 4294901760, %v3100_v15  ;;  %v1420_v51 = vsub.f32 %v3067_v2, %v1419_v30 }
 0x136   :  { %v1391_v50 = vand.u32 4294901760, %v3052_v40  ;;  %v3072_v48 = vsub.f32 %v1294_v22, %v3054_v31  ;;  %2306 = vmatpush3.msra.mxu0 %v3054_v31  ;;  %v1413_v42 = vsub.f32 %v3049_v63, %v1412_v20  ;;  %v1407_v26 = vand.u32 4294901760, %v1406_v9 }
 0x137   :  { %2307 = vmatprep.subr.mxu0 %v3448_v39  ;;  %v3148_v17 = vadd.f32 %v3455_v35, %v1025_v19  ;;  %v1282_v53 = vmax.f32 %v3114_v29, 0.0  ;;  %v3151_v22 = vand.u32 4294901760, %v1284_v59  ;;  %v3155_v28 = vand.u32 4294901760, %v37_v41 }
 0x138   :  { %v1392_v61 = vsub.f32 %v3052_v40, %v1391_v50  ;;  %v1398_v49 = vand.u32 4294901760, %v3072_v48  ;;  %2308 = vmatpush3.msra.mxu0 %v3023_v10  ;;  %v3158_v56 = vsub.f32 %v1286_v47, %v3117_v14  ;;  %v1440_v46 = vand.u32 4294901760, %v3121_v25 }
 0x139   :  { %2309 = vmatprep.subr.mxu0 %v3448_v39  ;;  %v1427_v18 = vsub.f32 %v3085_v57, %v1426_v11  ;;  %v1414_v58 = vand.u32 4294901760, %v1413_v42  ;;  %v1281_v5 = vmax.f32 %v3132_v62, 0.0  ;;  %v3166_v24 = vand.u32 4294901760, %v1283_v21 }
 0x13a   :  { %v1399_v3 = vsub.f32 %v3072_v48, %v1398_v49  ;;  %2310 = vmatpush3.msra.mxu0 %v3030_v60  ;;  %v1393_v52 = vand.u32 4294901760, %v1392_v61  ;;  %v3171_v38 = vsub.f32 %v1285_v1, %v3135_v54  ;;  %v1447_v34 = vand.u32 4294901760, %v3140_v16 }
 0x13b   :  { %2311 = vmatprep.subr.mxu0 %v3448_v39  ;;  %v1434_v4 = vsub.f32 %v3100_v15, %v1433_v33  ;;  %v1421_v47 = vand.u32 4294901760, %v1420_v51  ;;  %v1280_v61 = vmax.f32 %v3148_v17, 0.0  ;;  %v3179_v45 = vand.u32 4294901760, %v1282_v53 }
 0x13c   :  { %2312 = vmatpush3.msra.mxu0 %v3032_v12  ;;  %2339 = vmatpush3.msra.mxu1 %v1393_v52  ;;  %v1400_v43 = vand.u32 4294901760, %v1399_v3  ;;  %v3184_v37 = vsub.f32 %v37_v41, %v3155_v28  ;;  %v3187_v1 = vsub.f32 %v1284_v59, %v3151_v22  ;;  %v1454_v9 = vand.u32 4294901760, %v3158_v56 }
 0x13d   :  { %2313 = vmatprep.subr.mxu0 %v3448_v39  ;;  %2340 = vmatprep.subr.mxu1 %v3448_v39  ;;  %v1441_v3 = vsub.f32 %v3121_v25, %v1440_v46  ;;  %v1428_v52 = vand.u32 4294901760, %v1427_v18  ;;  %v3194_v13 = vand.u32 4294901760, %v1281_v5  ;;  %v3199_v55 = vsub.f32 %v1283_v21, %v3166_v24 }
 0x13e   :  { %2314 = vmatpush3.msra.mxu0 %v3046_v0  ;;  %2341 = vmatpush3.msra.mxu1 %v1400_v43  ;;  %v1461_v19 = vand.u32 4294901760, %v3171_v38  ;;  %v1448_v44 = vsub.f32 %v3140_v16, %v1447_v34  ;;  %v1435_v29 = vand.u32 4294901760, %v1434_v4  ;;  %v3206_v59 = vand.u32 4294901760, %v1280_v61 }
 0x13f   :  { %2315 = vmatprep.subr.mxu0 %v3448_v39  ;;  %2342 = vmatprep.subr.mxu1 %v3448_v39  ;;  %v1380_v42 = vand.u32 4294901760, %v3184_v37  ;;  %v3212_v43 = vsub.f32 %v1282_v53, %v3179_v45  ;;  %v1468_v41 = vand.u32 4294901760, %v3187_v1  ;;  %v1455_v8 = vsub.f32 %v3158_v56, %v1454_v9 }
 0x140   :  { %2316 = vmatpush3.msra.mxu0 %v3063_v7  ;;  %2343 = vmatpush3.msra.mxu1 %v1407_v26  ;;  %v1442_v62 = vand.u32 4294901760, %v1441_v3  ;;  %v3222_v21 = vsub.f32 %v1281_v5, %v3194_v13  ;;  %v1475_v51 = vand.u32 4294901760, %v3199_v55  ;;  %v1462_v26 = vsub.f32 %v3171_v38, %v1461_v19 }
 0x141   :  { %2317 = vmatprep.subr.mxu0 %v3448_v39  ;;  %2344 = vmatprep.subr.mxu1 %v3448_v39  ;;  %v1449_v35 = vand.u32 4294901760, %v1448_v44  ;;  %v1381_v17 = vsub.f32 %v3184_v37, %v1380_v42  ;;  %v3235_v53 = vsub.f32 %v1280_v61, %v3206_v59  ;;  %v1482_v18 = vand.u32 4294901760, %v3212_v43 }
 0x142   :  { %2318 = vmatpush3.msra.mxu0 %v3081_v6  ;;  %2345 = vmatpush3.msra.mxu1 %v1414_v58  ;;  %v1469_v58 = vsub.f32 %v3187_v1, %v1468_v41  ;;  %v1456_v5 = vand.u32 4294901760, %v1455_v8  ;;  %v1489_v4 = vand.u32 4294901760, %v3222_v21  ;;  %v1463_v61 = vand.u32 4294901760, %v1462_v26 }
 0x143   :  { %2319 = vmatprep.subr.mxu0 %v3448_v39  ;;  %2346 = vmatprep.subr.mxu1 %v3448_v39  ;;  %v1496_v3 = vand.u32 4294901760, %v3235_v53 }
 0x144   :  { %2320 = vmatpush3.msra.mxu0 %v3097_v32  ;;  %2347 = vmatpush3.msra.mxu1 %v1421_v47  ;;  %v1476_v47 = vsub.f32 %v3199_v55, %v1475_v51  ;;  %v1470_v44 = vand.u32 4294901760, %v1469_v58  ;;  %v1490_v8 = vsub.f32 %v3222_v21, %v1489_v4 }
 0x145   :  { %2321 = vmatprep.subr.mxu0 %v3448_v39  ;;  %2348 = vmatprep.subr.mxu1 %v3448_v39  ;;  %v1497_v26 = vsub.f32 %v3235_v53, %v1496_v3 }
 0x146   :  { %2322 = vmatpush3.msra.mxu0 %v3117_v14  ;;  %2349 = vmatpush3.msra.mxu1 %v1428_v52  ;;  %v1483_v52 = vsub.f32 %v3212_v43, %v1482_v18 }
 0x147   :  { %2323 = vmatprep.subr.mxu0 %v3448_v39  ;;  %2350 = vmatprep.subr.mxu1 %v3448_v39  ;;  %v1498_v58 = vand.u32 4294901760, %v1497_v26 }
 0x148   :  { %2324 = vmatpush3.msra.mxu0 %v3135_v54  ;;  %2351 = vmatpush3.msra.mxu1 %v1435_v29  ;;  %v1382_v29 = vand.u32 4294901760, %v1381_v17  ;;  %v1491_v17 = vand.u32 4294901760, %v1490_v8 }
 0x149   :  { %2325 = vmatprep.subr.mxu0 %v3448_v39  ;;  %2352 = vmatprep.subr.mxu1 %v3448_v39 }
 0x14a   :  { %2326 = vmatpush3.msra.mxu0 %v3151_v22  ;;  %2353 = vmatpush3.msra.mxu1 %v1442_v62  ;;  %v1477_v62 = vand.u32 4294901760, %v1476_v47 }
 0x14b   :  { %2327 = vmatprep.subr.mxu0 %v3448_v39  ;;  %2354 = vmatprep.subr.mxu1 %v3448_v39 }
 0x14c   :  { %2328 = vmatpush3.msra.mxu0 %v3166_v24  ;;  %2355 = vmatpush3.msra.mxu1 %v1449_v35  ;;  %v1484_v35 = vand.u32 4294901760, %v1483_v52 }
 0x14d   :  { %2329 = vmatprep.subr.mxu0 %v3448_v39  ;;  %2356 = vmatprep.subr.mxu1 %v3448_v39 }
 0x14e   :  { %2330 = vmatpush3.msra.mxu0 %v3179_v45  ;;  %2357 = vmatpush3.msra.mxu1 %v1456_v5 }
 0x14f   :  { %2331 = vmatprep.subr.mxu0 %v3448_v39  ;;  %2358 = vmatprep.subr.mxu1 %v3448_v39 }
 0x150   :  { %2332 = vmatpush3.msra.mxu0 %v3194_v13  ;;  %2359 = vmatpush3.msra.mxu1 %v1463_v61 }
 0x151   :  { %2333 = vmatprep.subr.mxu0 %v3448_v39  ;;  %2360 = vmatprep.subr.mxu1 %v3448_v39 }
 0x152   :  { %2334 = vmatpush3.msra.mxu0 %v3206_v59  ;;  %2361 = vmatpush3.msra.mxu1 %v1470_v44 }
 0x153   :  { %2362 = vmatprep.subr.mxu1 %v3448_v39  ;;  %2373 = vmatprep.subr.mxu0 %v3448_v39 }
 0x154   :  { %2336 = vmatmul.mubr.f32.vlgmr.msra.gmra.mxu0 %v1382_v29  ;;  %2363 = vmatpush3.msra.mxu1 %v1477_v62 }
 0x155   :  { %2374 = vmatpush3.msra.mxu0 %v3052_v40  ;;  %2364 = vmatprep.subr.mxu1 %v3448_v39 }
 0x156   :  { %2375 = vmatprep.subr.mxu0 %v3448_v39  ;;  %2365 = vmatpush3.msra.mxu1 %v1484_v35 }
 0x157   :  { %2376 = vmatpush3.msra.mxu0 %v3072_v48  ;;  %2366 = vmatprep.subr.mxu1 %v3448_v39 }
 0x158   :  { %2377 = vmatprep.subr.mxu0 %v3448_v39  ;;  %2367 = vmatpush3.msra.mxu1 %v1491_v17 }
 0x159   :  { %2378 = vmatpush3.msra.mxu0 %v3035_v27  ;;  %2368 = vmatprep.subr.mxu1 %v3448_v39 }
 0x15a   :  { %2379 = vmatprep.subr.mxu0 %v3448_v39  ;;  %2369 = vmatpush3.msra.mxu1 %v1498_v58 }
 0x15b   :  { %2380 = vmatpush3.msra.mxu0 %v3049_v63  ;;  %2371 = vmatmul.mubr.f32.vlgmr.msra.gmra.mxu1 %v3155_v28 }
 0x15c   :  { %2381 = vmatprep.subr.mxu0 %v3448_v39  ;;  %2408 = vmatprep.subr.mxu1 %v3448_v39 }
 0x15d   :  { %2382 = vmatpush3.msra.mxu0 %v3067_v2  ;;  %2409 = vmatpush3.msra.mxu1 %v3037_v23 }
 0x15e   :  { %2383 = vmatprep.subr.mxu0 %v3448_v39  ;;  %2410 = vmatprep.subr.mxu1 %v3448_v39 }
 0x15f   :  { %2384 = vmatpush3.msra.mxu0 %v3085_v57  ;;  %2411 = vmatpush3.msra.mxu1 %v3054_v31 }
 0x160   :  { %2385 = vmatprep.subr.mxu0 %v3448_v39  ;;  %2412 = vmatprep.subr.mxu1 %v3448_v39 }
 0x161   :  { %2386 = vmatpush3.msra.mxu0 %v3100_v15  ;;  %2413 = vmatpush3.msra.mxu1 %v3023_v10 }
 0x162   :  { %2387 = vmatprep.subr.mxu0 %v3448_v39  ;;  %2414 = vmatprep.subr.mxu1 %v3448_v39 }
 0x163   :  { %2388 = vmatpush3.msra.mxu0 %v3121_v25  ;;  %2415 = vmatpush3.msra.mxu1 %v3030_v60 }
 0x164   :  { %2389 = vmatprep.subr.mxu0 %v3448_v39  ;;  %2416 = vmatprep.subr.mxu1 %v3448_v39 }
 0x165   :  { %2390 = vmatpush3.msra.mxu0 %v3140_v16  ;;  %2417 = vmatpush3.msra.mxu1 %v3032_v12 }
 0x166   :  { %2391 = vmatprep.subr.mxu0 %v3448_v39  ;;  %2418 = vmatprep.subr.mxu1 %v3448_v39 }
 0x167   :  { %2392 = vmatpush3.msra.mxu0 %v3158_v56  ;;  %2419 = vmatpush3.msra.mxu1 %v3046_v0 }
 0x168   :  { %2393 = vmatprep.subr.mxu0 %v3448_v39  ;;  %2420 = vmatprep.subr.mxu1 %v3448_v39 }
 0x169   :  { %2394 = vmatpush3.msra.mxu0 %v3171_v38  ;;  %2421 = vmatpush3.msra.mxu1 %v3063_v7 }
 0x16a   :  { %2395 = vmatprep.subr.mxu0 %v3448_v39  ;;  %2422 = vmatprep.subr.mxu1 %v3448_v39 }
 0x16b   :  { %2396 = vmatpush3.msra.mxu0 %v3187_v1  ;;  %2423 = vmatpush3.msra.mxu1 %v3081_v6 }
 0x16c   :  { %2397 = vmatprep.subr.mxu0 %v3448_v39  ;;  %2424 = vmatprep.subr.mxu1 %v3448_v39 }
 0x16d   :  { %2398 = vmatpush3.msra.mxu0 %v3199_v55  ;;  %2425 = vmatpush3.msra.mxu1 %v3097_v32 }
 0x16e   :  { %2399 = vmatprep.subr.mxu0 %v3448_v39  ;;  %2426 = vmatprep.subr.mxu1 %v3448_v39 }
 0x16f   :  { %2400 = vmatpush3.msra.mxu0 %v3212_v43  ;;  %2427 = vmatpush3.msra.mxu1 %v3117_v14 }
 0x170   :  { %2401 = vmatprep.subr.mxu0 %v3448_v39  ;;  %2428 = vmatprep.subr.mxu1 %v3448_v39 }
 0x171   :  { %2402 = vmatpush3.msra.mxu0 %v3222_v21  ;;  %2429 = vmatpush3.msra.mxu1 %v3135_v54 }
 0x172   :  { %2403 = vmatprep.subr.mxu0 %v3448_v39  ;;  %2430 = vmatprep.subr.mxu1 %v3448_v39 }
 0x173   :  { %2404 = vmatpush3.msra.mxu0 %v3235_v53  ;;  %2405 = vmatprep.mubr.msk.f32.mxu0 %vm2520_vm2, %v3448_v39 }
 0x174   :  { %2431 = vmatpush3.msra.mxu1 %v3151_v22  ;;  %2406 = vmatmul.mubr.f32.vlgmr.msra.gmra.mxu0 %v3184_v37 }
 0x175   :  { %2432 = vmatprep.subr.mxu1 %v3448_v39  ;;  %2443 = vmatprep.subr.mxu0 %v3448_v39 }
 0x176   :  { %2433 = vmatpush3.msra.mxu1 %v3166_v24  ;;  %2444 = vmatpush3.msra.mxu0 %v1391_v50 }
 0x177   :  { %2434 = vmatprep.subr.mxu1 %v3448_v39  ;;  %2445 = vmatprep.subr.mxu0 %v3448_v39 }
 0x178   :  { %2435 = vmatpush3.msra.mxu1 %v3179_v45  ;;  %2446 = vmatpush3.msra.mxu0 %v1398_v49 }
 0x179   :  { %2436 = vmatprep.subr.mxu1 %v3448_v39  ;;  %2447 = vmatprep.subr.mxu0 %v3448_v39 }
 0x17a   :  { %2437 = vmatpush3.msra.mxu1 %v3194_v13  ;;  %2448 = vmatpush3.msra.mxu0 %v1405_v36 }
 0x17b   :  { %2438 = vmatprep.subr.mxu1 %v3448_v39  ;;  %2449 = vmatprep.subr.mxu0 %v3448_v39 }
 0x17c   :  { %2439 = vmatpush3.msra.mxu1 %v3206_v59  ;;  %2440 = vmatprep.mubr.msk.f32.mxu1 %vm2520_vm2, %v3448_v39 }
 0x17d   :  { %2450 = vmatpush3.msra.mxu0 %v1412_v20  ;;  %2441 = vmatmul.mubr.f32.vlgmr.msra.gmra.mxu1 %v1380_v42 }
 0x17e   :  { %2451 = vmatprep.subr.mxu0 %v3448_v39  ;;  %2478 = vmatprep.subr.mxu1 %v3448_v39 }
 0x17f   :  { %2452 = vmatpush3.msra.mxu0 %v1419_v30  ;;  %2479 = vmatpush3.msra.mxu1 %v3037_v23 }
 0x180   :  { %2453 = vmatprep.subr.mxu0 %v3448_v39  ;;  %2480 = vmatprep.subr.mxu1 %v3448_v39 }
 0x181   :  { %2454 = vmatpush3.msra.mxu0 %v1426_v11  ;;  %2481 = vmatpush3.msra.mxu1 %v3054_v31  ;;  %v1296_v31 = vstv %s3437_s4 }
 0x182   :  { %2455 = vmatprep.subr.mxu0 %v3448_v39  ;;  %2482 = vmatprep.subr.mxu1 %v3448_v39 }
 0x183   :  { %2456 = vmatpush3.msra.mxu0 %v1433_v33  ;;  %2483 = vmatpush3.msra.mxu1 %v3023_v10 }
 0x184   :  { %2457 = vmatprep.subr.mxu0 %v3448_v39  ;;  %2484 = vmatprep.subr.mxu1 %v3448_v39 }
 0x185   :  { %2458 = vmatpush3.msra.mxu0 %v1440_v46  ;;  %2485 = vmatpush3.msra.mxu1 %v3030_v60 }
 0x186   :  { %2459 = vmatprep.subr.mxu0 %v3448_v39  ;;  %2486 = vmatprep.subr.mxu1 %v3448_v39 }
 0x187   :  { %2460 = vmatpush3.msra.mxu0 %v1447_v34  ;;  %2487 = vmatpush3.msra.mxu1 %v3032_v12 }
 0x188   :  { %2461 = vmatprep.subr.mxu0 %v3448_v39  ;;  %2488 = vmatprep.subr.mxu1 %v3448_v39 }
 0x189   :  { %2462 = vmatpush3.msra.mxu0 %v1454_v9  ;;  %2489 = vmatpush3.msra.mxu1 %v3046_v0 }
 0x18a   :  { %2463 = vmatprep.subr.mxu0 %v3448_v39  ;;  %2490 = vmatprep.subr.mxu1 %v3448_v39 }
 0x18b   :  { %2464 = vmatpush3.msra.mxu0 %v1461_v19  ;;  %2491 = vmatpush3.msra.mxu1 %v3063_v7 }
 0x18c   :  { %2465 = vmatprep.subr.mxu0 %v3448_v39  ;;  %2492 = vmatprep.subr.mxu1 %v3448_v39 }
 0x18d   :  { %2466 = vmatpush3.msra.mxu0 %v1468_v41  ;;  %2493 = vmatpush3.msra.mxu1 %v3081_v6 }
 0x18e   :  { %2467 = vmatprep.subr.mxu0 %v3448_v39  ;;  %2494 = vmatprep.subr.mxu1 %v3448_v39 }
 0x18f   :  { %2468 = vmatpush3.msra.mxu0 %v1475_v51  ;;  %2495 = vmatpush3.msra.mxu1 %v3097_v32 }
 0x190   :  { %2469 = vmatprep.subr.mxu0 %v3448_v39  ;;  %2496 = vmatprep.subr.mxu1 %v3448_v39 }
 0x191   :  { %2470 = vmatpush3.msra.mxu0 %v1482_v18  ;;  %2497 = vmatpush3.msra.mxu1 %v3117_v14 }
 0x192   :  { %2471 = vmatprep.subr.mxu0 %v3448_v39  ;;  %2498 = vmatprep.subr.mxu1 %v3448_v39 }
 0x193   :  { %2472 = vmatpush3.msra.mxu0 %v1489_v4  ;;  %2499 = vmatpush3.msra.mxu1 %v3135_v54 }
 0x194   :  { %2473 = vmatprep.subr.mxu0 %v3448_v39  ;;  %2500 = vmatprep.subr.mxu1 %v3448_v39 }
 0x195   :  { %2474 = vmatpush3.msra.mxu0 %v1496_v3  ;;  %2475 = vmatprep.mubr.msk.f32.mxu0 %vm2520_vm2, %v3448_v39 }
 0x196   :  { %2501 = vmatpush3.msra.mxu1 %v3151_v22  ;;  %2476 = vmatmul.mubr.f32.vlgmr.msra.gmra.mxu0 %v3155_v28 }
 0x197   :  { %2502 = vmatprep.subr.mxu1 %v3448_v39  ;;  %2510 = vmatprep.mubr.msk.f32.mxu1 %vm2520_vm2, %v3448_v39 }
 0x198   :  { %2503 = vmatpush3.msra.mxu1 %v3166_v24 }
 0x199   :  { %2504 = vmatprep.subr.mxu1 %v3448_v39 }
 0x19a   :  { %2505 = vmatpush3.msra.mxu1 %v3179_v45 }
 0x19b   :  { %2506 = vmatprep.subr.mxu1 %v3448_v39 }
 0x19c   :  { %2507 = vmatpush3.msra.mxu1 %v3194_v13 }
 0x19d   :  { %2508 = vmatprep.subr.mxu1 %v3448_v39 }
 0x19e   :  { %2509 = vmatpush3.msra.mxu1 %v3206_v59 }
 0x19f   :  { %2511 = vmatmul.mubr.f32.vlgmr.msra.gmra.mxu1 %v3155_v28 }
 0x214   :  { %v1384_v10 = vpop.f32.mrf.mxu0 }
 0x215   :  { %v1385_v7 = vadd.f32 %v1384_v10, %v1296_v31 }
 0x216   :  { %v2337_v60 = vpop.f32.mrf.mxu0 }
 0x21b   :  { %v1535_v12 = vpop.f32.mrf.mxu1 }
 0x21c   :  { %v1536_v36 = vadd.f32 %v1535_v12, %v1385_v7 }
 0x21d   :  { %v2372_v27 = vpop.f32.mrf.mxu1 }
 0x234   :  { %v1639_v23 = vpop.f32.mrf.mxu0 }
 0x235   :  { %v1640_v50 = vadd.f32 %v1639_v23, %v1536_v36 }
 0x236   :  { %v2407_v0 = vpop.f32.mrf.mxu0 }
 0x23d   :  { %v1728_v63 = vpop.f32.mrf.mxu1 }
 0x23e   :  { %v1729_v48 = vadd.f32 %v1728_v63, %v1640_v50 }
 0x23f   :  { %v2442_v40 = vpop.f32.mrf.mxu1 }
 0x256   :  { %v1847_v2 = vpop.f32.mrf.mxu0 }
 0x257   :  { %v1848_v6 = vadd.f32 %v1847_v2, %v1729_v48 }
 0x258   :  { %v2477_v39 = vpop.f32.mrf.mxu0 }
 0x25f   :  { %v1934_v57 = vpop.f32.mrf.mxu1 }
 0x260   :  { %v1935_v20 = vadd.f32 %v1934_v57, %v1848_v6 }
 0x261   :  { %v2512_v49 = vpop.f32.mrf.mxu1 }
 0x262   :  { %1938 = vst [vmem:[%s3438_s5] sm:$0x1] %v1935_v20 }

</bundles_post_ra>
